<compile_context>
chip_gen: v6e
topology: v6e:2x2x1
jax: 0.10.0
libtpu: 0.0.40
codegen_flags: <defaults>
</compile_context>

<pallas_src>
import jax
import jax.numpy as jnp
from jax.experimental import pallas as pl
from jax.experimental.pallas import tpu as pltpu

OUT_LANES = 128  # lane-dense packed output width


# ------------------------------ Pallas kernel ------------------------------ #

def deconf_fused_kernel(x_ref, wband_ref, cbt_ref, wbig_ref, bht_ref, out_ref):
    """One batch block per grid step: conv3x3 + ReLU + GAP + h + g + quotient.

    x_ref    : [1, Bt, H+2, (W+2)*Cin]  bf16  spatially padded, W/C-merged NHWC images
    wband_ref: [3, (W+2)*Cin, W*Cout]   bf16  block-banded conv weight, one band per kh
    cbt_ref  : [1, W*Cout]              f32   conv bias tiled over the W lane groups
    wbig_ref : [W*Cout, n_cls+1]        bf16  GAP-folded merged head weight ([:, :n_cls]=h, [:, -1]=BN-folded g)
    bht_ref  : [1, n_cls+1]             f32   merged head bias
    out_ref  : [1, Bt, OUT_LANES]       f32   packed rows: [quot(n_cls) | numer(n_cls) | den(1) | zeros]
    """
    Bt = x_ref.shape[1]
    H = x_ref.shape[2] - 2
    Km = x_ref.shape[3]                      # (W+2)*Cin, conv contraction width
    n_cls = bht_ref.shape[1] - 1

    # --- 3x3 "same" conv as 3 lane-dense MXU matmuls (one per kernel row), register acc.
    acc = None
    for kh in range(3):                      # static unroll
        lhs = x_ref[0, :, kh:kh + H, :].reshape(Bt * H, Km)            # bf16 [Bt*H, Km]
        part = jnp.dot(lhs, wband_ref[kh],
                       preferred_element_type=jnp.float32)             # f32 [Bt*H, W*Cout]
        acc = part if acc is None else acc + part

    # Bias + ReLU (f32 VPU work).
    act = jnp.maximum(acc + cbt_ref[...], 0.0)                         # [Bt*H, W*Cout]

    # Global average pool, stage 1: sum over image rows (the per-column j/channel sum and
    # the 1/(H*W) factor are folded into wbig on the host).
    nwc = act.shape[-1]
    rows = jnp.sum(act.reshape(Bt, H, nwc), axis=1)                    # f32 [Bt, W*Cout]

    # --- heads: h and BN-folded g (plus GAP j-sum and 1/(H*W)) in ONE matmul.
    heads = jnp.dot(rows.astype(jnp.bfloat16), wbig_ref[...],
                    preferred_element_type=jnp.float32) + bht_ref[...]  # [Bt, n_cls+1]

    numer = heads[:, :n_cls]                                           # h(f)
    g_lin = heads[:, n_cls:n_cls + 1]                                  # BN-folded g linear
    e = jnp.exp(-g_lin)                                                # EUP
    den = 1.0 / (1.0 + e)                                              # sigmoid(g), exact
    quot = numer * (1.0 + e)                                           # numer / sigmoid(g), exact

    # Single unmasked lane-dense packed store.
    pad = jnp.zeros((Bt, OUT_LANES - (2 * n_cls + 1)), jnp.float32)
    out_ref[0] = jnp.concatenate([quot, numer, den, pad], axis=-1)


# -------------------------------- Wrapper ----------------------------------- #

def _pick_batch_tile(batch):
    # Keep >= 2 grid blocks (so both v7x TensorCores get work via the "parallel" axis)
    # while using up to 8 images per step to amortize per-grid-step pipeline overhead.
    if batch < 4:
        return 1
    return min(8, batch // 2)


def deconf_net_forward(x, params):
    """DeconfNet forward. x: [B, Cin, H, W] (NCHW, like the torch module)."""
    conv_w, conv_b, wh, bh, wg, bg, bn = params
    B, Cin, H, W = x.shape
    Cout = conv_w.shape[0]
    n_cls = wh.shape[0]
    assert 2 * n_cls + 1 <= OUT_LANES

    Bt = _pick_batch_tile(B)
    nb = (B + Bt - 1) // Bt
    B_pad = nb * Bt
    Km = (W + 2) * Cin              # merged (padded-width, channel) contraction dim
    NWC = W * Cout                  # lane-dense conv output width

    # NHWC, spatial "same" padding, batch padding, W/C merge -> [nb, Bt, H+2, Km] bf16.
    x_nhwc = jnp.transpose(x, (0, 2, 3, 1))
    x_pad = jnp.pad(x_nhwc, ((0, B_pad - B), (1, 1), (1, 1), (0, 0)))
    x_m = x_pad.reshape(nb, Bt, H + 2, Km).astype(jnp.bfloat16)

    # Block-banded conv weight, one [(W+2)*Cin, W*Cout] band per kernel row kh:
    #   wband[kh, jp*Cin + cin, j*Cout + cout] = conv_w[cout, cin, kh, jp - j]   (0 <= jp-j <= 2)
    w_khwc = jnp.transpose(conv_w, (2, 3, 1, 0))                                # [3,3,Cin,Cout]
    shifts = jnp.stack([jnp.eye(W + 2, W, k=-kw, dtype=jnp.float32)
                        for kw in range(3)])                                    # [3, W+2, W]
    wband = jnp.einsum('wpj,hwco->hpcjo', shifts, w_khwc)
    wband = wband.reshape(3, Km, NWC).astype(jnp.bfloat16)

    cb_tiled = jnp.tile(conv_b, W)[None].astype(jnp.float32)                    # [1, W*Cout]

    # Fold eval-mode BatchNorm1d into g's Linear; merge h & g; fold GAP j-sum + 1/(H*W).
    gamma, beta, mean, var = bn[0], bn[1], bn[2], bn[3]
    scale = gamma * jax.lax.rsqrt(var + 1e-5)
    wg_f = wg * scale                                                           # [1, Cout]
    bg_f = (bg - mean) * scale + beta                                           # [1]
    w_heads = jnp.concatenate([wh, wg_f], axis=0).T                             # [Cout, n_cls+1]
    w_big = (jnp.tile(w_heads, (W, 1)) / float(H * W)).astype(jnp.bfloat16)     # [W*Cout, n_cls+1]
    b_heads = jnp.concatenate([bh, bg_f], axis=0)[None].astype(jnp.float32)     # [1, n_cls+1]

    packed = pl.pallas_call(
        deconf_fused_kernel,
        out_shape=jax.ShapeDtypeStruct((nb, Bt, OUT_LANES), jnp.float32),
        grid=(nb,),
        in_specs=[
            pl.BlockSpec((1, Bt, H + 2, Km), lambda b: (b, 0, 0, 0)),
            pl.BlockSpec((3, Km, NWC), lambda b: (0, 0, 0)),
            pl.BlockSpec((1, NWC), lambda b: (0, 0)),
            pl.BlockSpec((NWC, n_cls + 1), lambda b: (0, 0)),
            pl.BlockSpec((1, n_cls + 1), lambda b: (0, 0)),
        ],
        out_specs=pl.BlockSpec((1, Bt, OUT_LANES), lambda b: (b, 0, 0)),
        compiler_params=pltpu.CompilerParams(
            dimension_semantics=("parallel",)),
    )(x_m, wband, cb_tiled, w_big, b_heads)

    packed = packed.reshape(B_pad, OUT_LANES)[:B]
    quotients = packed[:, :n_cls]
    numerators = packed[:, n_cls:2 * n_cls]
    denominators = packed[:, 2 * n_cls:2 * n_cls + 1]
    return quotients, numerators, denominators


# ---------------------------- Pure-JAX reference ---------------------------- #

def reference_forward(x, params):
    conv_w, conv_b, wh, bh, wg, bg, bn = params
    y = jax.lax.conv_general_dilated(
        x, conv_w, window_strides=(1, 1), padding=((1, 1), (1, 1)),
        dimension_numbers=("NCHW", "OIHW", "NCHW"))
    y = jnp.maximum(y + conv_b[None, :, None, None], 0.0)
    feat = jnp.mean(y, axis=(2, 3))                       # global average pool
    numer = feat @ wh.T + bh
    g = feat @ wg.T + bg
    gamma, beta, mean, var = bn[0], bn[1], bn[2], bn[3]
    g = (g - mean) * gamma * jax.lax.rsqrt(var + 1e-5) + beta
    den = jax.nn.sigmoid(g)
    return numer / den, numer, den


# ---------------------------------- Main ------------------------------------ #

if __name__ == "__main__":
    B, Cin, H, W = 2, 4, 16, 16
    Cout, n_cls = 32, 10

    # Deterministic example input.
    x = jax.random.normal(jax.random.PRNGKey(0), (B, Cin, H, W), dtype=jnp.float32)

    # Deterministic synthetic parameters (no checkpoint loading).
    k1, k2, k3, k4, k5, k6 = jax.random.split(jax.random.PRNGKey(42), 6)
    conv_w = jax.random.normal(k1, (Cout, Cin, 3, 3), jnp.float32) * 0.1   # torch [Cout,Cin,3,3]
    conv_b = jax.random.normal(k2, (Cout,), jnp.float32) * 0.1
    wh = jax.random.normal(k3, (n_cls, Cout), jnp.float32) * 0.1           # h: Linear(F, n_cls)
    bh = jax.random.normal(k4, (n_cls,), jnp.float32) * 0.1
    wg = jax.random.normal(k5, (1, Cout), jnp.float32) * 0.1               # g: Linear(F, 1)
    bg = jax.random.normal(k6, (1,), jnp.float32) * 0.1
    # BatchNorm1d(1) at init (eval mode): gamma=1, beta=0, running_mean=0, running_var=1.
    bn = jnp.array([1.0, 0.0, 0.0, 1.0], dtype=jnp.float32)

    params = (conv_w, conv_b, wh, bh, wg, bg, bn)

    quot, num, den = jax.block_until_ready(deconf_net_forward(x, params))

    assert quot.shape == (B, n_cls) and num.shape == (B, n_cls) and den.shape == (B, 1)

    # Loose-tolerance correctness check against a pure-JAX reference (bf16 MXU inputs).
    q_ref, n_ref, d_ref = reference_forward(x, params)
    assert jnp.allclose(num, n_ref, atol=2e-2, rtol=2e-2)
    assert jnp.allclose(den, d_ref, atol=2e-2, rtol=2e-2)
    assert jnp.allclose(quot, q_ref, atol=4e-2, rtol=4e-2)

    print("KERNEL_OK")
</pallas_src>

<mosaic_0001>
module attributes {stable_mosaic.version = 11 : i64} {
  func.func @deconf_fused_kernel(%arg0: i32, %arg1: memref<1x1x18x72xbf16, #tpu.memory_space<vmem>>, %arg2: memref<3x72x512xbf16, #tpu.memory_space<vmem>>, %arg3: memref<1x512xf32, #tpu.memory_space<vmem>>, %arg4: memref<512x11xbf16, #tpu.memory_space<vmem>>, %arg5: memref<1x11xf32, #tpu.memory_space<vmem>>, %arg6: memref<1x1x128xf32, #tpu.memory_space<vmem>>) attributes {dimension_semantics = [#tpu.dimension_semantics<parallel>], iteration_bounds = array<i64: 2>, scalar_prefetch = 0 : i64, scratch_operands = 0 : i64, tpu.core_type = #tpu.core_type<tc>, window_params = [{transform_indices = @transform_0, window_bounds = array<i64: 1, 1, 18, 72>}, {pipeline_mode = #tpu.pipeline_mode<synchronous>, transform_indices = @transform_1, window_bounds = array<i64: 3, 72, 512>}, {pipeline_mode = #tpu.pipeline_mode<synchronous>, transform_indices = @transform_2, window_bounds = array<i64: 1, 512>}, {pipeline_mode = #tpu.pipeline_mode<synchronous>, transform_indices = @transform_3, window_bounds = array<i64: 512, 11>}, {pipeline_mode = #tpu.pipeline_mode<synchronous>, transform_indices = @transform_4, window_bounds = array<i64: 1, 11>}, {transform_indices = @transform_5, window_bounds = array<i64: 1, 1, 128>}]} {
    %c0 = arith.constant 0 : index
    %c0_0 = arith.constant 0 : index
    %c0_1 = arith.constant 0 : index
    %c0_2 = arith.constant 0 : index
    %0 = vector.load %arg1[%c0, %c0_0, %c0_1, %c0_2] : memref<1x1x18x72xbf16, #tpu.memory_space<vmem>>, vector<1x1x16x72xbf16>
    %1 = vector.shape_cast %0 : vector<1x1x16x72xbf16> to vector<1x16x72xbf16>
    %2 = vector.shape_cast %1 : vector<1x16x72xbf16> to vector<16x72xbf16>
    %c0_3 = arith.constant 0 : index
    %c0_4 = arith.constant 0 : index
    %c0_5 = arith.constant 0 : index
    %3 = vector.load %arg2[%c0_3, %c0_4, %c0_5] : memref<3x72x512xbf16, #tpu.memory_space<vmem>>, vector<1x72x512xbf16>
    %4 = vector.shape_cast %3 : vector<1x72x512xbf16> to vector<72x512xbf16>
    %cst = arith.constant dense<0.000000e+00> : vector<16x512xf32>
    %5 = tpu.matmul %2, %4, %cst {dimension_numbers = #tpu.dot_dimension_numbers<[1], [0], [0], [1], [0, 0, 1, 1], [], []>} : vector<16x72xbf16>, vector<72x512xbf16>, vector<16x512xf32> -> vector<16x512xf32>
    %c0_6 = arith.constant 0 : index
    %c0_7 = arith.constant 0 : index
    %c1 = arith.constant 1 : index
    %c0_8 = arith.constant 0 : index
    %6 = vector.load %arg1[%c0_6, %c0_7, %c1, %c0_8] : memref<1x1x18x72xbf16, #tpu.memory_space<vmem>>, vector<1x1x16x72xbf16>
    %7 = vector.shape_cast %6 : vector<1x1x16x72xbf16> to vector<1x16x72xbf16>
    %8 = vector.shape_cast %7 : vector<1x16x72xbf16> to vector<16x72xbf16>
    %c1_9 = arith.constant 1 : index
    %c0_10 = arith.constant 0 : index
    %c0_11 = arith.constant 0 : index
    %9 = vector.load %arg2[%c1_9, %c0_10, %c0_11] : memref<3x72x512xbf16, #tpu.memory_space<vmem>>, vector<1x72x512xbf16>
    %10 = vector.shape_cast %9 : vector<1x72x512xbf16> to vector<72x512xbf16>
    %cst_12 = arith.constant dense<0.000000e+00> : vector<16x512xf32>
    %11 = tpu.matmul %8, %10, %cst_12 {dimension_numbers = #tpu.dot_dimension_numbers<[1], [0], [0], [1], [0, 0, 1, 1], [], []>} : vector<16x72xbf16>, vector<72x512xbf16>, vector<16x512xf32> -> vector<16x512xf32>
    %12 = arith.addf %5, %11 : vector<16x512xf32>
    %c0_13 = arith.constant 0 : index
    %c0_14 = arith.constant 0 : index
    %c2 = arith.constant 2 : index
    %c0_15 = arith.constant 0 : index
    %13 = vector.load %arg1[%c0_13, %c0_14, %c2, %c0_15] : memref<1x1x18x72xbf16, #tpu.memory_space<vmem>>, vector<1x1x16x72xbf16>
    %14 = vector.shape_cast %13 : vector<1x1x16x72xbf16> to vector<1x16x72xbf16>
    %15 = vector.shape_cast %14 : vector<1x16x72xbf16> to vector<16x72xbf16>
    %c2_16 = arith.constant 2 : index
    %c0_17 = arith.constant 0 : index
    %c0_18 = arith.constant 0 : index
    %16 = vector.load %arg2[%c2_16, %c0_17, %c0_18] : memref<3x72x512xbf16, #tpu.memory_space<vmem>>, vector<1x72x512xbf16>
    %17 = vector.shape_cast %16 : vector<1x72x512xbf16> to vector<72x512xbf16>
    %cst_19 = arith.constant dense<0.000000e+00> : vector<16x512xf32>
    %18 = tpu.matmul %15, %17, %cst_19 {dimension_numbers = #tpu.dot_dimension_numbers<[1], [0], [0], [1], [0, 0, 1, 1], [], []>} : vector<16x72xbf16>, vector<72x512xbf16>, vector<16x512xf32> -> vector<16x512xf32>
    %19 = arith.addf %12, %18 : vector<16x512xf32>
    %c0_20 = arith.constant 0 : index
    %c0_21 = arith.constant 0 : index
    %20 = vector.load %arg3[%c0_20, %c0_21] : memref<1x512xf32, #tpu.memory_space<vmem>>, vector<1x512xf32>
    %21 = vector.broadcast %20 : vector<1x512xf32> to vector<16x512xf32>
    %22 = arith.addf %19, %21 : vector<16x512xf32>
    %cst_22 = arith.constant 0.000000e+00 : f32
    %23 = vector.broadcast %cst_22 : f32 to vector<16x512xf32>
    %24 = arith.maximumf %22, %23 : vector<16x512xf32>
    %25 = vector.shape_cast %24 : vector<16x512xf32> to vector<1x16x512xf32>
    %cst_23 = arith.constant dense<0.000000e+00> : vector<1x512xf32>
    %26 = vector.multi_reduction <add>, %25, %cst_23 [1] : vector<1x16x512xf32> to vector<1x512xf32>
    %27 = arith.truncf %26 : vector<1x512xf32> to vector<1x512xbf16>
    %c0_24 = arith.constant 0 : index
    %c0_25 = arith.constant 0 : index
    %28 = vector.load %arg4[%c0_24, %c0_25] : memref<512x11xbf16, #tpu.memory_space<vmem>>, vector<512x11xbf16>
    %cst_26 = arith.constant dense<0.000000e+00> : vector<1x11xf32>
    %29 = tpu.matmul %27, %28, %cst_26 {dimension_numbers = #tpu.dot_dimension_numbers<[1], [0], [0], [1], [0, 0, 1, 1], [], []>} : vector<1x512xbf16>, vector<512x11xbf16>, vector<1x11xf32> -> vector<1x11xf32>
    %c0_27 = arith.constant 0 : index
    %c0_28 = arith.constant 0 : index
    %30 = vector.load %arg5[%c0_27, %c0_28] : memref<1x11xf32, #tpu.memory_space<vmem>>, vector<1x11xf32>
    %31 = arith.addf %29, %30 : vector<1x11xf32>
    %32 = vector.extract_strided_slice %31 {offsets = [0, 0], sizes = [1, 10], strides = [1, 1]} : vector<1x11xf32> to vector<1x10xf32>
    %33 = vector.extract_strided_slice %31 {offsets = [0, 10], sizes = [1, 1], strides = [1, 1]} : vector<1x11xf32> to vector<1x1xf32>
    %cst_29 = arith.constant 0.000000e+00 : f32
    %34 = vector.broadcast %cst_29 : f32 to vector<1x1xf32>
    %35 = arith.subf %34, %33 : vector<1x1xf32>
    %36 = math.exp %35 : vector<1x1xf32>
    %cst_30 = arith.constant 1.000000e+00 : f32
    %37 = vector.broadcast %cst_30 : f32 to vector<1x1xf32>
    %38 = arith.addf %37, %36 : vector<1x1xf32>
    %cst_31 = arith.constant 1.000000e+00 : f32
    %39 = vector.broadcast %cst_31 : f32 to vector<1x1xf32>
    %40 = arith.divf %39, %38 : vector<1x1xf32>
    %cst_32 = arith.constant 1.000000e+00 : f32
    %41 = vector.broadcast %cst_32 : f32 to vector<1x1xf32>
    %42 = arith.addf %41, %36 : vector<1x1xf32>
    %43 = vector.broadcast %42 : vector<1x1xf32> to vector<1x10xf32>
    %44 = arith.mulf %32, %43 : vector<1x10xf32>
    %cst_33 = arith.constant 0.000000e+00 : f32
    %45 = vector.broadcast %cst_33 : f32 to vector<1x107xf32>
    %46 = tpu.concatenate %44, %32, %40, %45 in 1 : vector<1x10xf32>, vector<1x10xf32>, vector<1x1xf32>, vector<1x107xf32> -> vector<1x128xf32>
    %c0_34 = arith.constant 0 : index
    %c0_35 = arith.constant 0 : index
    %c0_36 = arith.constant 0 : index
    %47 = vector.load %arg6[%c0_34, %c0_35, %c0_36] : memref<1x1x128xf32, #tpu.memory_space<vmem>>, vector<1x1x128xf32>
    %48 = vector.shape_cast %47 : vector<1x1x128xf32> to vector<1x128xf32>
    %49 = vector.shape_cast %46 : vector<1x128xf32> to vector<1x1x128xf32>
    tpu.vector_store %arg6[%c0_34, %c0_35, %c0_36], %49 {strides = array<i32>} : memref<1x1x128xf32, #tpu.memory_space<vmem>>, vector<1x1x128xf32>,
    return
  }
  func.func @transform_0(%arg0: i32) -> (i32, i32, i32, i32) {
    %c0_i32 = arith.constant 0 : i32
    %c0_i32_0 = arith.constant 0 : i32
    %c0_i32_1 = arith.constant 0 : i32
    %c0_i32_2 = arith.constant 0 : i32
    return %arg0, %c0_i32, %c0_i32_0, %c0_i32_1 : i32, i32, i32, i32
  }
  func.func @transform_1(%arg0: i32) -> (i32, i32, i32) {
    %c0_i32 = arith.constant 0 : i32
    %c0_i32_0 = arith.constant 0 : i32
    %c0_i32_1 = arith.constant 0 : i32
    %c0_i32_2 = arith.constant 0 : i32
    return %c0_i32, %c0_i32_0, %c0_i32_1 : i32, i32, i32
  }
  func.func @transform_2(%arg0: i32) -> (i32, i32) {
    %c0_i32 = arith.constant 0 : i32
    %c0_i32_0 = arith.constant 0 : i32
    %c0_i32_1 = arith.constant 0 : i32
    return %c0_i32, %c0_i32_0 : i32, i32
  }
  func.func @transform_3(%arg0: i32) -> (i32, i32) {
    %c0_i32 = arith.constant 0 : i32
    %c0_i32_0 = arith.constant 0 : i32
    %c0_i32_1 = arith.constant 0 : i32
    return %c0_i32, %c0_i32_0 : i32, i32
  }
  func.func @transform_4(%arg0: i32) -> (i32, i32) {
    %c0_i32 = arith.constant 0 : i32
    %c0_i32_0 = arith.constant 0 : i32
    %c0_i32_1 = arith.constant 0 : i32
    return %c0_i32, %c0_i32_0 : i32, i32
  }
  func.func @transform_5(%arg0: i32) -> (i32, i32, i32) {
    %c0_i32 = arith.constant 0 : i32
    %c0_i32_0 = arith.constant 0 : i32
    %c0_i32_1 = arith.constant 0 : i32
    return %arg0, %c0_i32, %c0_i32_0 : i32, i32, i32
  }
}

</mosaic_0001>

<bundles_post_ra>
// kernel: tpu_custom_call.1
= control target key start
LH: loop header
LB: loop body
LE: loop exit
PB: predicated region body
PF: predicated region fallthrough
CT: control target
= control target key end

     0   :  { %10 = vsyncpa [#allocation3], 0  ;;  %s2149_s0 = inlined_call_operand.vmem [shape: bf16[2,1,18,72], index: 0, kind: input, shape index: {}]   ;;  %s2150_s1 = inlined_call_operand.hbm [shape: bf16[3,72,512], index: 1, kind: input, shape index: {}]   ;;  %s2151_s2 = inlined_call_operand.vmem [shape: f32[1,512], index: 2, kind: input, shape index: {}]   ;;  %s2152_s3 = inlined_call_operand.vmem [shape: bf16[512,11], index: 3, kind: input, shape index: {}]   ;;  %s2153_s4 = inlined_call_operand.vmem [shape: f32[1,11], index: 4, kind: input, shape index: {}]   ;;  %s2154_s5 = inlined_call_operand.hbm [shape: f32[2,1,128], index: 5, kind: output, shape index: {}]  }
   0x1   :  { %11 = vsyncpa [#allocation4], 0 }
   0x2   :  { %13 = vsyncpa [#allocation4 + $0x1], 0  ;;  %s1892_s18 = smov 0   ;;  %s1894_s19 = smov 0  }
   0x3   :  { %s1896_s20 = smov 0   ;;  %s1898_s21 = smov 0  }
   0x4 LB: > { %s1913_s22 = sadd.s32 4294967295, %s1853_s21   ;;  %s1422_s23 = sadd.s32 4294967294, %s1853_s21   ;;  %s1853_s21 = sphi %s1898_s21, %s2162_s21   ;;  %s1849_s20 = sphi %s1896_s20, %s2161_s20   ;;  %s1845_s19 = sphi %s1894_s19, %s2160_s19   ;;  %s1841_s18 = sphi %s1892_s18, %s2159_s18  }
   0x5   : > { %s1917_s24 = sadd.s32 1, %s1853_s21   ;;  %s136_s25 = sadd.s32 1, %s1849_s20 }
   0x6   : > { %s133_s26 = ssub.s32 %s1853_s21, %s1917_s24  ;;  %p146_p0 = scmp.ne.s32.totalorder %s1849_s20, %s1845_s19 }
   0x7   : > { %p134_p1 = scmp.eq.s32.totalorder %s133_s26, 0  ;;  %p147_p2 = scmp.eq.s32.totalorder %s1913_s22, 1 }
   0x8   : > { %p152_p3 = scmp.ne.s32.totalorder %s1845_s19, %s1841_s18  ;;  %p153_p4 = scmp.eq.s32.totalorder %s1422_s23, 1 }
   0x9   : > { %s1928_s27 = scalar_select %p134_p1, %s1849_s20, %s136_s25  }
   0xa   : > { %p1930_p5 = por %p147_p2, %p146_p0  ;;  %p1934_p6 = por %p153_p4, %p152_p3 }
   0xb   : > { %p1423_p7 = scmp.ge.s32.totalorder %s1853_s21, 1  ;;  %p160_p8 = scmp.lt.s32.totalorder %s1853_s21, 3 }
   0xc   : > { %s2156_s29 = scalar_select %p1934_p6, 1, 0 }
   0xd   : > { %p1598_p9 = scmp.eq.s32.totalorder %s1913_s22, 0  ;;  %p1941_p10 = pnand %p1423_p7, %p160_p8 }
   0xe   : > { %s1855_s6 = smov [#allocation2]  }
   0xf   : > { %s172_s7 = sshll.u32 %s1855_s6, 4  ;;  %p1590_p11 = pneg %p1941_p10  ;;  %s173_s7 = int_to_ptr.vmem [resolvable:$true] %s172_s7 }
  0x10   : > { %s1774_s8 = scalar_lea.vmem %s173_s7, 6912  ;;  %p1782_p3 = scmp.lt.s32.totalorder %s173_s7, %s173_s7 }
  0x11   : > { %p1591_p12 = pnand %p1598_p9, %p1590_p11  ;;  %p1775_p0 = scmp.ne.s32.totalorder %s173_s7, %s1774_s8 }
  0x12   : > { %p1783_p4 = scmp.lt.s32.totalorder %s1774_s8, %s1774_s8 }
  0x13   : > { %p1765_p13 = pneg %p1591_p12 }
  0x14   : > { %p1784_p6 = por %p1783_p4, %p1782_p3 }
  0x15   : > { %p1777_p1 = pnand %p1775_p0, %p1765_p13 }
  0x17   : > { %p1778_p2 = pneg %p1777_p1 }
  0x19   : > { %p1785_p7 = pnand %p1784_p6, %p1778_p2 }
  0x1b   : > { %1788 = shalt.err (!%p1785_p7)
}
  0x1c   : > { %s1856_s9 = smov 256   ;;  %s1857_s10 = smov 16  }
  0x1d   : > { %1593 = dma.hbm_to_vmem [thread:$0]  (!%p1591_p12), %s2150_s1, 6912, %s173_s7, [#allocation3], %s1856_s9, %s1856_s9, %s1857_s10  }
  0x1e   : > { %205 = sbr.rel (%p1941_p10) target bundleno = 686 (0x2ae), region = 40 }
  0x23   : > { %1832 = dma.done.wait (%p1598_p9), [#allocation3], 6912  }
  0x24   : > { %1834 = vsyncadd (%p1598_p9), [#allocation3], 4294960384  ;;  %v1858_v0 = vmov 0   ;;  %p232_p6 = scmp.lt.s32.totalorder %s1913_s22, 1  ;;  %v276_v1 = vld [vmem:[#allocation2 + $0x110] sm:$0xff]  ;;  %vm393_vm0 = vcmask 1043456  }
  0x25   : > { %438 = vmatprep.mubr.bf16.mxu0 %v1858_v0  ;;  %481 = vmatprep.mubr.bf16.mxu1 %v1858_v0  ;;  %v277_v2 = vld [vmem:[#allocation2 + $0x118] sm:$0xff]  ;;  %v1448_v3 = vcombine.high %v276_v1, %v276_v1  ;;  %v1447_v5 = vcombine.low %v276_v1, %v276_v1  ;;  %v1644_v7 = vld [vmem:[#allocation2 + $0xf4] ss:$16 sps:$4 sm:$0xff]   ;;  %v1648_v11 = vld [vmem:[#allocation2 + $0xf0] ss:$16 sps:$4 sm:$0xff]   ;;  %vm389_vm2 = vcmask 588800  }
  0x26   : > { %s233_s13 = scalar_select %p232_p6, %s1913_s22, 1  ;;  %v1450_v4 = vcombine.high %v277_v2, %v277_v2  ;;  %v1449_v6 = vcombine.low %v277_v2, %v277_v2  ;;  %v1646_v8 = vld [vmem:[#allocation2 + $0xfc] ss:$16 sps:$4 sm:$0xff]   ;;  %v1649_v12 = vld [vmem:[#allocation2 + $0xf8] ss:$16 sps:$4 sm:$0xff]   ;;  %v256_v27 = vld [vmem:[#allocation2 + $0x80] sm:$0xff] }
  0x27   : > { %1451 = vmatprep.subr.msk.bf16.mxu0 %vm393_vm0, %v1448_v3  ;;  %v395_v9 = vsel %vm393_vm0, %v1447_v5, 0  ;;  %v1650_v13 = vld [vmem:[#allocation2 + $0xd4] ss:$16 sps:$4 sm:$0xff]   ;;  %v1652_v14 = vld [vmem:[#allocation2 + $0xdc] ss:$16 sps:$4 sm:$0xff]   ;;  %v1471_v36 = vcombine.low %v256_v27, %v256_v27  ;;  %v1472_v37 = vcombine.high %v256_v27, %v256_v27  ;;  %vm705_vm3 = vcmask 1046528  }
  0x28   : > { %1453 = vmatprep.subr.msk.bf16.mxu1 %vm393_vm0, %v1450_v4  ;;  %v401_v10 = vsel %vm393_vm0, %v1449_v6, 0  ;;  %413 = vmatpush1.bf16.msra.mxu0 %v395_v9  ;;  %s1583_s14 = smul.u32 12, %s233_s13  ;;  %v1654_v15 = vld [vmem:[#allocation2 + $0xd0] ss:$16 sps:$4 sm:$0xff]   ;;  %v1655_v16 = vld [vmem:[#allocation2 + $0xd8] ss:$16 sps:$4 sm:$0xff]  }
  0x29   : > { %456 = vmatpush1.bf16.msra.mxu1 %v401_v10  ;;  %414 = vmatprep.subr.bf16.mxu0 %v1644_v7  ;;  %v1656_v17 = vld [vmem:[#allocation2 + $0xb4] ss:$16 sps:$4 sm:$0xff]   ;;  %v1658_v18 = vld [vmem:[#allocation2 + $0xbc] ss:$16 sps:$4 sm:$0xff]   ;;  %v1660_v19 = vld [vmem:[#allocation2 + $0xb0] ss:$16 sps:$4 sm:$0xff]  }
  0x2a   : > { %457 = vmatprep.subr.bf16.mxu1 %v1646_v8  ;;  %s1969_s17 = scalar_lea.vmem %s2149_s0, %s1583_s14  ;;  %v1661_v20 = vld [vmem:[#allocation2 + $0xb8] ss:$16 sps:$4 sm:$0xff]   ;;  %v1662_v21 = vld [vmem:[#allocation2 + $0x94] ss:$16 sps:$4 sm:$0xff]   ;;  %v1664_v22 = vld [vmem:[#allocation2 + $0x9c] ss:$16 sps:$4 sm:$0xff]  }
  0x2b   : > { %v238_v23 = vld [vmem:[%s1969_s17] sm:$0xf]  ;;  %v1973_v24 = vld [vmem:[%s1969_s17 + $0x4] sm:$0xf]  ;;  %v257_v31 = vld [vmem:[#allocation2 + $0x88] sm:$0xff]  ;;  %v585_v42 = vsel %vm393_vm0, %v1471_v36, 0 }
  0x2c   : > { %415 = vmatpush1.bf16.msra.mxu0 %v1648_v11  ;;  %v1976_v25 = vcombine.low %v238_v23, %v1973_v24  ;;  %v1979_v26 = vld [vmem:[%s1969_s17 + $0x8] ss:$0 sps:$4 sm:$0x11]   ;;  %v1666_v32 = vld [vmem:[#allocation2 + $0x90] ss:$16 sps:$4 sm:$0xff]   ;;  %v1474_v38 = vcombine.high %v257_v31, %v257_v31  ;;  %v1473_v39 = vcombine.low %v257_v31, %v257_v31  ;;  %v1729_v27 = vld [vmem:[%s2152_s3 + $0x38] sm:$0xff]  }
  0x2d   : > { %458 = vmatpush1.bf16.msra.mxu1 %v1649_v12  ;;  %416 = vmatprep.subr.bf16.mxu0 %v1650_v13  ;;  %v295_v30 = vshll.u32 %v1979_v26, 16  ;;  %v1667_v33 = vld [vmem:[#allocation2 + $0x98] ss:$16 sps:$4 sm:$0xff]   ;;  %vm286_vm1 = vsmask.f32 7424  ;;  %v700_v53 = vld [vmem:[#allocation2 + $0x1a0] sm:$0xff] }
  0x2e   : > { %459 = vmatprep.subr.bf16.mxu1 %v1652_v14  ;;  %v288_v28 = vshrl.u32 %v1976_v25, 16  ;;  %v290_v29 = vshll.u32 %v1976_v25, 16  ;;  %v591_v43 = vsel %vm393_vm0, %v1473_v39, 0  ;;  %v1676_v44 = vld [vmem:[#allocation2 + $0x64] ss:$16 sps:$4 sm:$0xff]   ;;  %v701_v56 = vld [vmem:[#allocation2 + $0x1a8] sm:$0xff]  ;;  %v1496_v57 = vcombine.low %v700_v53, %v700_v53 }
  0x2f   : > { %v297_v35 = vrot.slane %v295_v30, 1  ;;  %v1679_v45 = vld [vmem:[#allocation2 + $0x6c] ss:$16 sps:$4 sm:$0xff]   ;;  %v1674_v46 = vld [vmem:[#allocation2 + $0x60] ss:$16 sps:$4 sm:$0xff]   ;;  %v1498_v62 = vcombine.low %v701_v56, %v701_v56  ;;  %v707_v3 = vrot.slane %v1979_v26, 1  ;;  %v1497_v5 = vcombine.high %v700_v53, %v700_v53 }
  0x30   : > { %417 = vmatpush1.bf16.msra.mxu0 %v1654_v15  ;;  %v292_v34 = vrot.slane %v290_v29, 1  ;;  %v1677_v47 = vld [vmem:[#allocation2 + $0x68] ss:$16 sps:$4 sm:$0xff]   ;;  %v1682_v48 = vld [vmem:[#allocation2 + $0x44] ss:$16 sps:$4 sm:$0xff]   ;;  %v803_v1 = vsel %vm393_vm0, %v1496_v57, 0  ;;  %v1499_v6 = vcombine.high %v701_v56, %v701_v56 }
  0x31   : > { %460 = vmatpush1.bf16.msra.mxu1 %v1655_v16  ;;  %418 = vmatprep.subr.bf16.mxu0 %v1656_v17  ;;  %v1685_v49 = vld [vmem:[#allocation2 + $0x4c] ss:$16 sps:$4 sm:$0xff]   ;;  %v1680_v50 = vld [vmem:[#allocation2 + $0x40] ss:$16 sps:$4 sm:$0xff]   ;;  %v1683_v51 = vld [vmem:[#allocation2 + $0x48] ss:$16 sps:$4 sm:$0xff]  }
  0x32   : > { %461 = vmatprep.subr.bf16.mxu1 %v1658_v18  ;;  %v293_v40 = vor.u32 %v292_v34, %v288_v28  ;;  %v1688_v52 = vld [vmem:[#allocation2 + $0x24] ss:$16 sps:$4 sm:$0xff]   ;;  %v1691_v54 = vld [vmem:[#allocation2 + $0x2c] ss:$16 sps:$4 sm:$0xff]   ;;  %v1686_v55 = vld [vmem:[#allocation2 + $0x20] ss:$16 sps:$4 sm:$0xff]  }
  0x33   : > { %v1689_v58 = vld [vmem:[#allocation2 + $0x28] ss:$16 sps:$4 sm:$0xff]   ;;  %v1694_v59 = vld [vmem:[#allocation2 + $0x4] ss:$16 sps:$4 sm:$0xff]   ;;  %v1697_v60 = vld [vmem:[#allocation2 + $0xc] ss:$16 sps:$4 sm:$0xff]  }
  0x34   : > { %419 = vmatpush1.bf16.msra.mxu0 %v1660_v19  ;;  %v298_v41 = vsel %vm286_vm1, %v293_v40, %v297_v35  ;;  %v1692_v61 = vld [vmem:[#allocation2] ss:$16 sps:$4 sm:$0xff]   ;;  %v1695_v63 = vld [vmem:[#allocation2 + $0x8] ss:$16 sps:$4 sm:$0xff]   ;;  %v809_v7 = vsel %vm393_vm0, %v1498_v62, 0  ;;  %s1860_s6 = smov 10  }
  0x35   : > { %462 = vmatpush1.bf16.msra.mxu1 %v1661_v20  ;;  %420 = vmatprep.subr.bf16.mxu0 %v1662_v21  ;;  %v682_v2 = vld [vmem:[%s1969_s17] sm:$0xe]  ;;  %v1704_v9 = vld [vmem:[#allocation2 + $0x184] ss:$16 sps:$4 sm:$0xff]   ;;  %v1707_v10 = vld [vmem:[#allocation2 + $0x18c] ss:$16 sps:$4 sm:$0xff]  }
  0x36   : > { %463 = vmatprep.subr.bf16.mxu1 %v1664_v22  ;;  %v1479_v4 = vcombine.low %v682_v2, %v1973_v24  ;;  %v1702_v11 = vld [vmem:[#allocation2 + $0x180] ss:$16 sps:$4 sm:$0xff]   ;;  %v1705_v12 = vld [vmem:[#allocation2 + $0x188] ss:$16 sps:$4 sm:$0xff]   ;;  %v1710_v13 = vld [vmem:[#allocation2 + $0x164] ss:$16 sps:$4 sm:$0xff]  }
  0x37   : > { %v1713_v14 = vld [vmem:[#allocation2 + $0x16c] ss:$16 sps:$4 sm:$0xff]   ;;  %v1708_v15 = vld [vmem:[#allocation2 + $0x160] ss:$16 sps:$4 sm:$0xff]   ;;  %v1711_v16 = vld [vmem:[#allocation2 + $0x168] ss:$16 sps:$4 sm:$0xff]  }
  0x38   : > { %421 = vmatpush1.bf16.msra.mxu0 %v1666_v32  ;;  %v706_v8 = vrot.slane %v1479_v4, 1  ;;  %v1716_v17 = vld [vmem:[#allocation2 + $0x144] ss:$16 sps:$4 sm:$0xff]   ;;  %v1719_v18 = vld [vmem:[#allocation2 + $0x14c] ss:$16 sps:$4 sm:$0xff]   ;;  %s230_s7 = sand.u32 1, %s1845_s19  }
  0x39   : > { %464 = vmatpush1.bf16.msra.mxu1 %v1667_v33  ;;  %1475 = vmatprep.subr.msk.bf16.mxu0 %vm393_vm0, %v1472_v37  ;;  %v1714_v19 = vld [vmem:[#allocation2 + $0x140] ss:$16 sps:$4 sm:$0xff]   ;;  %v1717_v20 = vld [vmem:[#allocation2 + $0x148] ss:$16 sps:$4 sm:$0xff]   ;;  %v1722_v21 = vld [vmem:[#allocation2 + $0x124] ss:$16 sps:$4 sm:$0xff]  }
  0x3a   : > { %1477 = vmatprep.subr.msk.bf16.mxu1 %vm393_vm0, %v1474_v38  ;;  %v1725_v22 = vld [vmem:[#allocation2 + $0x12c] ss:$16 sps:$4 sm:$0xff]   ;;  %v1720_v23 = vld [vmem:[#allocation2 + $0x120] ss:$16 sps:$4 sm:$0xff]   ;;  %v1723_v24 = vld [vmem:[#allocation2 + $0x128] ss:$16 sps:$4 sm:$0xff]  }
  0x3b   : > { %1452 = vmatmul.mubr.msk.bf16.vlgmr.msra.gmra.mxu0 %vm389_vm2, %v298_v41  ;;  %v1728_v26 = vld [vmem:[%s2152_s3 + $0xf8] sm:$0xff]   ;;  %v1731_v29 = vld [vmem:[%s2152_s3 + $0x70] sm:$0xff]   ;;  %v1735_v33 = vld [vmem:[%s2152_s3 + $0x68] sm:$0xff]   ;;  %vm1335_vm4 = vcmask 80896   ;;  %vm1337_vm5 = vcmask 162816   ;;  %s1536_s8 = sshll.u32 %s1913_s22, 4 }
  0x3c   : > { %1454 = vmatmul.mubr.msk.bf16.vlgmr.msra.gmra.mxu1 %vm389_vm2, %v298_v41  ;;  %603 = vmatpush1.bf16.msra.mxu0 %v585_v42  ;;  %v1730_v28 = vld [vmem:[%s2152_s3 + $0xb8] sm:$0xff]   ;;  %v1732_v30 = vld [vmem:[%s2152_s3 + $0xf0] sm:$0xff]   ;;  %v1736_v34 = vld [vmem:[%s2152_s3 + $0xe8] sm:$0xff]   ;;  %s231_s9 = scalar_lea.vmem [#allocation5], %s230_s7  ;;  %vm1339_vm6 = vcmask 171008   ;;  %s2114_s13 = scalar_lea.hbm %s2154_s5, %s1536_s8 }
  0x3d   : > { %646 = vmatpush1.bf16.msra.mxu1 %v591_v43  ;;  %604 = vmatprep.subr.bf16.mxu0 %v1676_v44  ;;  %v1733_v31 = vld [vmem:[%s2152_s3 + $0x30] sm:$0xff]   ;;  %v1737_v35 = vld [vmem:[%s2152_s3 + $0x28] sm:$0xff]   ;;  %v1739_v37 = vld [vmem:[%s2152_s3 + $0x60] sm:$0xff]   ;;  %s1355_s10 = sshll.u32 %s231_s9, 4  ;;  %s1343_s14 = scalar_lea.sflag [#allocation4], %s230_s7  ;;  %s1356_s10 = int_to_ptr.vmem [resolvable:$true] %s1355_s10 }
  0x3e   : > { %647 = vmatprep.subr.bf16.mxu1 %v1679_v45  ;;  %628 = vmatprep.mubr.bf16.mxu0 %v1858_v0  ;;  %v1734_v32 = vld [vmem:[%s2152_s3 + $0xb0] sm:$0xff]   ;;  %v1738_v36 = vld [vmem:[%s2152_s3 + $0xa8] sm:$0xff]   ;;  %v1740_v38 = vld [vmem:[%s2152_s3 + $0xe0] sm:$0xff]   ;;  %s1789_s15 = scalar_lea.vmem %s1356_s10, 16  ;;  %s1861_s22 = smov [#allocation5]  }
  0x3f   : > { %671 = vmatprep.mubr.bf16.mxu1 %v1858_v0  ;;  %v1741_v39 = vld [vmem:[%s2152_s3 + $0x20] sm:$0xff]   ;;  %v1743_v41 = vld [vmem:[%s2152_s3 + $0x58] sm:$0xff]   ;;  %v1747_v45 = vld [vmem:[%s2152_s3 + $0x50] sm:$0xff]   ;;  %p1790_p8 = scmp.ne.s32.totalorder %s1356_s10, %s1789_s15  ;;  %s1793_s16 = sshll.u32 %s1861_s22, 4  ;;  %s1794_s16 = int_to_ptr.vmem [resolvable:$false] %s1793_s16 }
  0x40   : > { %605 = vmatpush1.bf16.msra.mxu0 %v1674_v46  ;;  %v1742_v40 = vld [vmem:[%s2152_s3 + $0xa0] sm:$0xff]   ;;  %v1744_v42 = vld [vmem:[%s2152_s3 + $0xd8] sm:$0xff]   ;;  %v1748_v46 = vld [vmem:[%s2152_s3 + $0xd0] sm:$0xff]   ;;  %s1795_s17 = scalar_lea.vmem %s1794_s16, 32  ;;  %p1796_p11 = scmp.lt.s32.totalorder %s1356_s10, %s1794_s16 }
  0x41   : > { %648 = vmatpush1.bf16.msra.mxu1 %v1677_v47  ;;  %606 = vmatprep.subr.bf16.mxu0 %v1682_v48  ;;  %v1745_v43 = vld [vmem:[%s2152_s3 + $0x18] sm:$0xff]   ;;  %v1749_v47 = vld [vmem:[%s2152_s3 + $0x10] sm:$0xff]   ;;  %v1755_v53 = vld [vmem:[%s2152_s3 + $0x40] sm:$0xff]   ;;  %p1791_p9 = pnand %p1790_p8, %p1930_p5  ;;  %p1797_p12 = scmp.lt.s32.totalorder %s1795_s17, %s1789_s15 }
  0x42   : > { %649 = vmatprep.subr.bf16.mxu1 %v1685_v49  ;;  %v1746_v44 = vld [vmem:[%s2152_s3 + $0x98] sm:$0xff]   ;;  %v1750_v48 = vld [vmem:[%s2152_s3 + $0x90] sm:$0xff]   ;;  %v1751_v49 = vld [vmem:[%s2152_s3 + $0x48] sm:$0xff]  }
  0x43   : > { %v1758_v56 = vld [vmem:[%s2152_s3 + $0x80] sm:$0xff]   ;;  %p1792_p10 = pneg %p1791_p9  ;;  %p1798_p13 = por %p1797_p12, %p1796_p11 }
  0x44   : > { %607 = vmatpush1.bf16.msra.mxu0 %v1680_v50  ;;  %v1752_v50 = vld [vmem:[%s2152_s3 + $0xc8] sm:$0xff]  }
  0x45   : > { %650 = vmatpush1.bf16.msra.mxu1 %v1683_v51  ;;  %608 = vmatprep.subr.bf16.mxu0 %v1688_v52  ;;  %v1753_v51 = vld [vmem:[%s2152_s3 + $0x8] sm:$0xff]   ;;  %p1799_p0 = pnand %p1798_p13, %p1792_p10 }
  0x46   : > { %651 = vmatprep.subr.bf16.mxu1 %v1691_v54  ;;  %v1754_v52 = vld [vmem:[%s2152_s3 + $0x88] sm:$0xff]   ;;  %v1756_v54 = vld [vmem:[%s2152_s3 + $0xc0] sm:$0xff]  }
  0x48   : > { %609 = vmatpush1.bf16.msra.mxu0 %v1686_v55  ;;  %v1757_v55 = vld [vmem:[%s2152_s3] sm:$0xff]  }
  0x49   : > { %652 = vmatpush1.bf16.msra.mxu1 %v1689_v58  ;;  %610 = vmatprep.subr.bf16.mxu0 %v1694_v59 }
  0x4a   : > { %653 = vmatprep.subr.bf16.mxu1 %v1697_v60 }
  0x4c   : > { %611 = vmatpush1.bf16.msra.mxu0 %v1692_v61 }
  0x4d   : > { %654 = vmatpush1.bf16.msra.mxu1 %v1695_v63  ;;  %1500 = vmatprep.subr.msk.bf16.mxu0 %vm393_vm0, %v1497_v5 }
  0x4e   : > { %1502 = vmatprep.subr.msk.bf16.mxu1 %vm393_vm0, %v1499_v6  ;;  %v910_v6 = vlaneseq }
  0x4f   : > { %1476 = vmatmul.mubr.msk.bf16.vlgmr.msra.gmra.mxu0 %vm389_vm2, %v1976_v25 }
  0x50   : > { %1478 = vmatmul.mubr.msk.bf16.vlgmr.msra.gmra.mxu1 %vm389_vm2, %v1976_v25  ;;  %821 = vmatpush1.bf16.msra.mxu0 %v803_v1  ;;  %v1727_v25 = vld [vmem:[%s2152_s3 + $0x78] sm:$0xff]  }
  0x51   : > { %864 = vmatpush1.bf16.msra.mxu1 %v809_v7  ;;  %822 = vmatprep.subr.bf16.mxu0 %v1704_v9  ;;  %v911_v9 = vshrl.u32 %v910_v6, 7 }
  0x52   : > { %865 = vmatprep.subr.bf16.mxu1 %v1707_v10  ;;  %846 = vmatprep.mubr.bf16.mxu0 %v1858_v0 }
  0x53   : > { %889 = vmatprep.mubr.bf16.mxu1 %v1858_v0  ;;  %v708_v0 = vsel %vm705_vm3, %v706_v8, %v707_v3 }
  0x54   : > { %823 = vmatpush1.bf16.msra.mxu0 %v1702_v11 }
  0x55   : > { %866 = vmatpush1.bf16.msra.mxu1 %v1705_v12  ;;  %824 = vmatprep.subr.bf16.mxu0 %v1710_v13  ;;  %v912_v12 = vsub.s32 0, %v911_v9  ;;  %v920_v13 = vsub.s32 2, %v911_v9 }
  0x56   : > { %867 = vmatprep.subr.bf16.mxu1 %v1713_v14  ;;  %v908_v14 = vld [vmem:[%s2151_s2] sm:$0xf] }
  0x58   : > { %825 = vmatpush1.bf16.msra.mxu0 %v1708_v15  ;;  %v916_v15 = vsub.s32 1, %v911_v9 }
  0x59   : > { %868 = vmatpush1.bf16.msra.mxu1 %v1711_v16  ;;  %826 = vmatprep.subr.bf16.mxu0 %v1716_v17  ;;  %v924_v16 = vsub.s32 3, %v911_v9 }
  0x5a   : > { %869 = vmatprep.subr.bf16.mxu1 %v1719_v18 }
  0x5c   : > { %827 = vmatpush1.bf16.msra.mxu0 %v1714_v19 }
  0x5d   : > { %870 = vmatpush1.bf16.msra.mxu1 %v1717_v20  ;;  %828 = vmatprep.subr.bf16.mxu0 %v1722_v21 }
  0x5e   : > { %871 = vmatprep.subr.bf16.mxu1 %v1725_v22 }
  0x60   : > { %829 = vmatpush1.bf16.msra.mxu0 %v1720_v23 }
  0x61   : > { %872 = vmatpush1.bf16.msra.mxu1 %v1723_v24  ;;  %1539 = vmatprep.subr.bf16.mxu0 %v1727_v25  ;;  %v913_v24 = vrot.slane %v908_v14, %v912_v12  ;;  %v921_v25 = vrot.slane %v908_v14, %v920_v13 }
  0x62   : > { %1561 = vmatprep.subr.bf16.mxu1 %v1728_v26 }
  0x63   : > { %1501 = vmatmul.mubr.msk.bf16.vlgmr.msra.gmra.mxu0 %vm389_vm2, %v708_v0 }
  0x64   : > { %1503 = vmatmul.mubr.msk.bf16.vlgmr.msra.gmra.mxu1 %vm389_vm2, %v708_v0  ;;  %1540 = vmatpush3.bf16.msra.mxu0 %v1729_v27 }
  0x65   : > { %1562 = vmatpush3.bf16.msra.mxu1 %v1730_v28  ;;  %1541 = vmatprep.subr.bf16.mxu0 %v1731_v29  ;;  %v917_v29 = vrot.slane %v908_v14, %v916_v15 }
  0x66   : > { %1563 = vmatprep.subr.bf16.mxu1 %v1732_v30 }
  0x68   : > { %1542 = vmatpush3.bf16.msra.mxu0 %v1733_v31  ;;  %v925_v31 = vrot.slane %v908_v14, %v924_v16 }
  0x69   : > { %1564 = vmatpush3.bf16.msra.mxu1 %v1734_v32  ;;  %1543 = vmatprep.subr.bf16.mxu0 %v1735_v33 }
  0x6a   : > { %1565 = vmatprep.subr.bf16.mxu1 %v1736_v34 }
  0x6c   : > { %1544 = vmatpush3.bf16.msra.mxu0 %v1737_v35 }
  0x6d   : > { %1566 = vmatpush3.bf16.msra.mxu1 %v1738_v36  ;;  %1545 = vmatprep.subr.bf16.mxu0 %v1739_v37 }
  0x6e   : > { %1567 = vmatprep.subr.bf16.mxu1 %v1740_v38 }
  0x70   : > { %1546 = vmatpush3.bf16.msra.mxu0 %v1741_v39 }
  0x71   : > { %1568 = vmatpush3.bf16.msra.mxu1 %v1742_v40  ;;  %1547 = vmatprep.subr.bf16.mxu0 %v1743_v41 }
  0x72   : > { %1569 = vmatprep.subr.bf16.mxu1 %v1744_v42 }
  0x74   : > { %1548 = vmatpush3.bf16.msra.mxu0 %v1745_v43 }
  0x75   : > { %1570 = vmatpush3.bf16.msra.mxu1 %v1746_v44  ;;  %1549 = vmatprep.subr.bf16.mxu0 %v1747_v45 }
  0x76   : > { %1571 = vmatprep.subr.bf16.mxu1 %v1748_v46 }
  0x78   : > { %1550 = vmatpush3.bf16.msra.mxu0 %v1749_v47 }
  0x79   : > { %1572 = vmatpush3.bf16.msra.mxu1 %v1750_v48  ;;  %1551 = vmatprep.subr.bf16.mxu0 %v1751_v49 }
  0x7a   : > { %1573 = vmatprep.subr.bf16.mxu1 %v1752_v50 }
  0x7c   : > { %1552 = vmatpush3.bf16.msra.mxu0 %v1753_v51 }
  0x7d   : > { %1574 = vmatpush3.bf16.msra.mxu1 %v1754_v52  ;;  %1553 = vmatprep.subr.bf16.mxu0 %v1755_v53 }
  0x7e   : > { %1575 = vmatprep.subr.bf16.mxu1 %v1756_v54 }
  0x80   : > { %1554 = vmatpush3.bf16.msra.mxu0 %v1757_v55 }
  0x81   : > { %1576 = vmatpush3.bf16.msra.mxu1 %v1758_v56 }
  0xfb   : > { %v440_v57 = vpop.f32.mrf.mxu0 }
  0xfc   : > { %v483_v58 = vpop.f32.mrf.mxu1 }
  0xfd   : > { %v442_v59 = vpop.f32.mrf.mxu0 }
  0xfe   : > { %v485_v60 = vpop.f32.mrf.mxu1 }
  0xff   : > { %v444_v61 = vpop.f32.mrf.mxu0 }
 0x100   : > { %v487_v62 = vpop.f32.mrf.mxu1 }
 0x101   : > { %v446_v63 = vpop.f32.mrf.mxu0 }
 0x102   : > { %v489_v1 = vpop.f32.mrf.mxu1 }
 0x10f   : > { %v630_v2 = vpop.f32.mrf.mxu0 }
 0x110   : > { %v673_v3 = vpop.f32.mrf.mxu1  ;;  %v631_v17 = vadd.f32 %v630_v2, %v440_v57 }
 0x111   : > { %v632_v4 = vpop.f32.mrf.mxu0  ;;  %v674_v18 = vadd.f32 %v673_v3, %v483_v58 }
 0x112   : > { %v675_v5 = vpop.f32.mrf.mxu1  ;;  %v633_v21 = vadd.f32 %v632_v4, %v442_v59 }
 0x113   : > { %v634_v7 = vpop.f32.mrf.mxu0  ;;  %v676_v22 = vadd.f32 %v675_v5, %v485_v60 }
 0x114   : > { %v677_v8 = vpop.f32.mrf.mxu1  ;;  %v635_v32 = vadd.f32 %v634_v7, %v444_v61 }
 0x115   : > { %v636_v10 = vpop.f32.mrf.mxu0  ;;  %v678_v33 = vadd.f32 %v677_v8, %v487_v62 }
 0x116   : > { %v679_v11 = vpop.f32.mrf.mxu1  ;;  %v637_v36 = vadd.f32 %v636_v10, %v446_v63 }
 0x117   : > { %v680_v37 = vadd.f32 %v679_v11, %v489_v1 }
 0x123   : > { %v848_v19 = vpop.f32.mrf.mxu0 }
 0x124   : > { %v891_v20 = vpop.f32.mrf.mxu1  ;;  %v900_v23 = vadd.f32 %v848_v19, %v631_v17 }
 0x125   : > { %v902_v0 = vadd.f32 %v891_v20, %v674_v18  ;;  %v850_v26 = vpop.f32.mrf.mxu0 }
 0x126   : > { %v893_v27 = vpop.f32.mrf.mxu1  ;;  %v901_v28 = vadd.f32 %v850_v26, %v633_v21  ;;  %v930_v38 = vadd.f32 %v913_v24, %v900_v23 }
 0x127   : > { %v903_v30 = vadd.f32 %v893_v27, %v676_v22  ;;  %v852_v34 = vpop.f32.mrf.mxu0  ;;  %v932_v39 = vadd.f32 %v921_v25, %v902_v0 }
 0x128   : > { %v895_v35 = vpop.f32.mrf.mxu1  ;;  %v904_v40 = vadd.f32 %v852_v34, %v635_v32  ;;  %v931_v44 = vadd.f32 %v917_v29, %v901_v28  ;;  %v938_v52 = vmax.f32 %v930_v38, 0.0  ;;  %v1859_v28 = vmov 10  }
 0x129   : > { %v906_v41 = vadd.f32 %v895_v35, %v678_v33  ;;  %v854_v42 = vpop.f32.mrf.mxu0  ;;  %v933_v45 = vadd.f32 %v925_v31, %v903_v30  ;;  %v940_v53 = vmax.f32 %v932_v39, 0.0  ;;  %1639 = vset.pattern.permute.xlu0 %v1859_v28 }
 0x12a   : > { %v897_v43 = vpop.f32.mrf.mxu1  ;;  %v905_v46 = vadd.f32 %v854_v42, %v637_v36  ;;  %v934_v48 = vadd.f32 %v913_v24, %v904_v40  ;;  %v939_v56 = vmax.f32 %v931_v44, 0.0 }
 0x12b   : > { %v907_v47 = vadd.f32 %v897_v43, %v680_v37  ;;  %v936_v49 = vadd.f32 %v921_v25, %v906_v41  ;;  %v941_v57 = vmax.f32 %v933_v45, 0.0 }
 0x12c   : > { %v935_v50 = vadd.f32 %v917_v29, %v905_v46  ;;  %v942_v54 = vmax.f32 %v934_v48, 0.0 }
 0x12d   : > { %v937_v51 = vadd.f32 %v925_v31, %v907_v47  ;;  %v944_v55 = vmax.f32 %v936_v49, 0.0  ;;  %v1042_v31 = vld [vmem:[%s2153_s4] sm:$0x1] }
 0x12e   : > { %v943_v58 = vmax.f32 %v935_v50, 0.0  ;;  %v946_v60 = vadd.f32 %v942_v54, %v938_v52 }
 0x12f   : > { %v945_v59 = vmax.f32 %v937_v51, 0.0  ;;  %v960_v61 = vadd.f32 %v944_v55, %v940_v53 }
 0x130   : > { %v953_v62 = vadd.f32 %v943_v58, %v939_v56  ;;  %v947_v1 = vrot.slane %v946_v60, 4 }
 0x131   : > { %v967_v63 = vadd.f32 %v945_v59, %v941_v57  ;;  %v961_v2 = vrot.slane %v960_v61, 4 }
 0x132   : > { %v954_v3 = vrot.slane %v953_v62, 4  ;;  %v948_v5 = vadd.f32 %v947_v1, %v946_v60 }
 0x133   : > { %v968_v4 = vrot.slane %v967_v63, 4  ;;  %v962_v6 = vadd.f32 %v961_v2, %v960_v61 }
 0x134   : > { %v955_v7 = vadd.f32 %v954_v3, %v953_v62  ;;  %v949_v9 = vrot.slane %v948_v5, 2 }
 0x135   : > { %v969_v8 = vadd.f32 %v968_v4, %v967_v63  ;;  %v963_v10 = vrot.slane %v962_v6, 2 }
 0x136   : > { %v956_v11 = vrot.slane %v955_v7, 2  ;;  %v950_v13 = vadd.f32 %v949_v9, %v948_v5 }
 0x137   : > { %v970_v12 = vrot.slane %v969_v8, 2  ;;  %v964_v14 = vadd.f32 %v963_v10, %v962_v6 }
 0x138   : > { %v957_v15 = vadd.f32 %v956_v11, %v955_v7  ;;  %v951_v17 = vrot.slane %v950_v13, 1 }
 0x139   : > { %v971_v16 = vadd.f32 %v970_v12, %v969_v8  ;;  %v965_v18 = vrot.slane %v964_v14, 1 }
 0x13a   : > { %v958_v19 = vrot.slane %v957_v15, 1  ;;  %v952_v21 = vadd.f32 %v951_v17, %v950_v13 }
 0x13b   : > { %v972_v20 = vrot.slane %v971_v16, 1  ;;  %v966_v22 = vadd.f32 %v965_v18, %v964_v14 }
 0x13c   : > { %v959_v23 = vadd.f32 %v958_v19, %v957_v15  ;;  %v974_v26 = vpack.c.bf16 %v952_v21, %v952_v21 }
 0x13d   : > { %v973_v24 = vadd.f32 %v972_v20, %v971_v16  ;;  %v976_v27 = vpack.c.bf16 %v966_v22, %v966_v22 }
 0x13e   : > { %v975_v0 = vpack.c.bf16 %v959_v23, %v959_v23 }
 0x13f   : > { %v977_v25 = vpack.c.bf16 %v973_v24, %v973_v24 }
 0x140   : > { %1267 = vmatprep.mubr.bf16.mxu0 %v975_v0 }
 0x141   : > { %1307 = vmatprep.mubr.bf16.mxu1 %v977_v25  ;;  %1268 = vmatmul.mubr.bf16.vlgmr.msra.gmra.mxu0 %v974_v26 }
 0x142   : > { %1308 = vmatmul.mubr.bf16.vlgmr.msra.gmra.mxu1 %v976_v27 }
 0x201   : > { %v1555_v29 = vpop.f32.mrf.mxu0 }
 0x202   : > { %v1577_v30 = vpop.f32.mrf.mxu1 }
 0x203   : > { %v1556_v32 = vpop.f32.mrf.mxu0 }
 0x204   : > { %v1578_v33 = vpop.f32.mrf.mxu1  ;;  %v1557_v34 = vadd.f32 %v1556_v32, %v1555_v29 }
 0x205   : > { %v1558_v35 = vpop.f32.mrf.mxu0  ;;  %v1579_v38 = vadd.f32 %v1578_v33, %v1577_v30 }
 0x206   : > { %v1580_v36 = vpop.f32.mrf.mxu1  ;;  %v1270_v37 = vadd.f32 %v1557_v34, %v1042_v31 }
 0x207   : > { %v1559_v39 = vpop.f32.mrf.mxu0 }
 0x208   : > { %v1581_v40 = vpop.f32.mrf.mxu1  ;;  %v1310_v41 = vadd.f32 %v1579_v38, %v1270_v37 }
 0x20a   : > { %v1315_v42 = vsub.f32 0.0, %v1310_v41 }
 0x20c   : > { %v1316_v43 = vmul.f32 1.442695, %v1315_v42 }
 0x20e   : > { %1759 = vpow2.f32 %v1316_v43 }
 0x21b   : > { %v1760_v44 = vpop.eup %1759 }
 0x21c   : > { %v1318_v45 = vadd.f32 1.0, %v1760_v44 }
 0x21e   : > { %1323 = vperm.xlu0 %1639, %v1318_v45   ;;  %1761 = vrcp.f32 %v1318_v45 }
 0x222   : > { %1328 = vrot.lane.b32.xlu0 %v1310_v41, %s1860_s6 }
 0x22b   : > { %v1762_v46 = vpop.eup %1761 }
 0x22c   : > { %1332 = vrot.lane.b32.xlu1 %v1762_v46, %s1860_s6 }
 0x299   : > { %v1324_v47 = vpop.permute.xlu0 %1323 }
 0x29a   : > { %v1326_v48 = vmul.f32 %v1324_v47, %v1310_v41 }
 0x29d   : > { %v1329_v49 = vpop.permute.xlu0 %1328 }
 0x29e   : > { %v1336_v50 = vsel %vm1335_vm4, %v1326_v48, %v1329_v49  ;;  %v1333_v51 = vpop.permute.xlu1 %1332 }
 0x29f   : > { %v1338_v52 = vsel %vm1337_vm5, %v1336_v50, %v1333_v51 }
 0x2a0   : > { %v1340_v53 = vsel %vm1339_vm6, %v1338_v52, 0.0 }
 0x2a1   : > { %1341 = vst [vmem:[%s231_s9] sm:$0x1] %v1340_v53 }
 0x2a2   : > { %1802 = shalt.err (!%p1799_p0)
}
 0x2a3   : > { %s1803_s23 = scalar_lea.hbm %s2114_s13, 16  ;;  %s1807_s30 = scalar_lea.hbm %s2154_s5, 32 }
 0x2a4   : > { %p1804_p1 = scmp.ne.s32.totalorder %s2114_s13, %s1803_s23  ;;  %p1808_p4 = scmp.lt.s32.totalorder %s2114_s13, %s2154_s5 }
 0x2a5   : > { %p1809_p7 = scmp.lt.s32.totalorder %s1807_s30, %s1803_s23 }
 0x2a6   : > { %p1805_p2 = pnand %p1804_p1, %p1930_p5 }
 0x2a7   : > { %p1810_p6 = por %p1809_p7, %p1808_p4 }
 0x2a8   : > { %p1806_p3 = pneg %p1805_p2 }
 0x2aa   : > { %p1811_p8 = pnand %p1810_p6, %p1806_p3 }
 0x2ac   : > { %1814 = shalt.err (!%p1811_p8)
}
 0x2ad   : > { %1588 = dma.vmem_to_hbm [thread:$0]  (%p1930_p5), %s1356_s10, 16, %s2114_s13, %s1343_s14  }
 0x2ae PF: > { %p1600_p9 = scmp.ge.s32.totalorder %s1853_s21, 2  ;;  %s1367_s8 = sand.u32 1, %s1841_s18  }
 0x2af   : > { %p2158_p10 = scmp.ne.s32.totalorder %s2156_s29, 0  ;;  %s1368_s9 = scalar_lea.sflag [#allocation4], %s1367_s8 }
 0x2b1   : > { %p1595_p11 = pnand %p1600_p9, %p2158_p10 }
 0x2b3   : > { %p1596_p12 = pneg %p1595_p11 }
 0x2b5   : > { %1836 = dma.done.wait (%p1596_p12), %s1368_s9, 16  }
 0x2b6   : > { %1838 = vsyncadd (%p1596_p12), %s1368_s9, 4294967280  ;;  %p16_p13 = scmp.ge.s32.totalorder %s1917_s24, 4   ;;  %s2159_s18 = smov %s1845_s19 }
 0x2b7   : > { %s2160_s19 = smov %s1849_s20  ;;  %s2161_s20 = smov %s1928_s27 }
 0x2b8   : > { %s2162_s21 = smov %s1917_s24  ;;  %18 = sbr.rel (!%p16_p13) target bundleno = 4 (0x4), region = 82 }
 0x2bd   :  { %1372 = vsyncpa [#allocation3], 1 }
 0x2be   :  { %1374 = vsyncpa [#allocation3 + $0x1], 1 }
 0x2bf   :  { %1375 = vsyncpa [#allocation4], 1 }
 0x2c0   :  { %1377 = vsyncpa [#allocation4 + $0x1], 1 }

</bundles_post_ra>
